<compile_context>
chip_gen: v5e
topology: v5e:2x2
jax: 0.10.0
libtpu: 0.0.40
codegen_flags: <defaults>
</compile_context>

<pallas_src>
import functools

import jax
import jax.numpy as jnp
import numpy as np
from jax.experimental import pallas as pl
from jax.experimental.pallas import tpu as pltpu


def make_divisible(v, divisor=8, min_value=None, round_limit=0.9):
    # timm's make_divisible (used by SEModule for reduced channels)
    min_value = min_value or divisor
    new_v = max(min_value, int(v + divisor / 2) // divisor * divisor)
    if new_v < round_limit * v:
        new_v += divisor
    return new_v


# ----------------------------- Pallas kernel ---------------------------------


def _kernel(x_ref, y_ref,
            fc1x_ref, fc1y_ref, fc1b_ref,
            fc2x_ref, fc2y_ref, fc2bx_ref, fc2by_ref,
            w0x_ref, w0y_ref, b0_ref,
            w1b_ref, b1_ref,
            out_ref, *, NB, H, WC, td):
    x3 = x_ref[...]                                   # (NB, H, WC)  lane-dense
    y3 = y_ref[...]
    M = NB * H
    x2 = x3.reshape(M, WC)
    y2 = y3.reshape(M, WC)

    if td:
        # --- SE squeeze: row-sum over H; the 1/(H*W) and the per-pixel fold over W are
        #     baked into the expanded fc1 weights (K = W*C matmul).
        mx = jnp.sum(x3, axis=1)                      # (NB, WC)
        my = jnp.sum(y3, axis=1)
        s1 = jnp.maximum(
            jnp.dot(mx, fc1x_ref[...], preferred_element_type=jnp.float32)
            + jnp.dot(my, fc1y_ref[...], preferred_element_type=jnp.float32)
            + fc1b_ref[...], 0.0)                     # (NB, R)
        # --- SE gate, already expanded to (NB, W*C) so it multiplies lane-dense slabs.
        gx = jax.nn.sigmoid(jnp.dot(s1, fc2x_ref[...],
                                    preferred_element_type=jnp.float32) + fc2bx_ref[...])
        gy = jax.nn.sigmoid(jnp.dot(s1, fc2y_ref[...],
                                    preferred_element_type=jnp.float32) + fc2by_ref[...])
        xg = (x3 * gx[:, None, :]).reshape(M, WC)     # (M, WC)
        yg = (y3 * gy[:, None, :]).reshape(M, WC)

        # --- conv0 (1x1, 2C -> C) as block-diagonal K=W*C matmuls (one per half).
        attn = (jnp.dot(xg, w0x_ref[...], preferred_element_type=jnp.float32)
                + jnp.dot(yg, w0y_ref[...], preferred_element_type=jnp.float32)
                + b0_ref[...])                        # (M, WC)
        u2 = x2 * attn
        v2 = y2 * attn
    else:
        u2 = x2
        v2 = y2

    # --- conv1 (3x3, 'same') as 3 banded (W*C x W*C) matmuls; u and v stacked along M.
    z = jnp.concatenate([u2.reshape(NB, H, WC), v2.reshape(NB, H, WC)], axis=0)  # (2NB,H,WC)
    zero_row = jnp.zeros((2 * NB, 1, WC), jnp.float32)
    z_up = jnp.concatenate([zero_row, z[:, :H - 1, :]], axis=1)   # rows h-1 (dy=0)
    z_dn = jnp.concatenate([z[:, 1:, :], zero_row], axis=1)       # rows h+1 (dy=2)
    M2 = 2 * NB * H
    acc = (jnp.dot(z_up.reshape(M2, WC), w1b_ref[0], preferred_element_type=jnp.float32)
           + jnp.dot(z.reshape(M2, WC), w1b_ref[1], preferred_element_type=jnp.float32)
           + jnp.dot(z_dn.reshape(M2, WC), w1b_ref[2], preferred_element_type=jnp.float32))
    acc = jnp.maximum(acc + b1_ref[...], 0.0)         # (M2, WC)

    out_ref[...] = jnp.abs(acc[:M] - acc[M:]).reshape(NB, H, WC)  # lane-dense store


# --------------------------- weight expansion ----------------------------------


def _expand_params(p, H, W):
    """Expand per-channel weights to lane-dense (W*C wide) matrices."""
    C = p["w1"].shape[2]
    inv_hw = jnp.float32(1.0 / (H * W))
    eye_w = jnp.eye(W, dtype=jnp.float32)
    # conv1 (3x3) banded block matrices: band[dy][(w+dx-1)*C+ci, w*C+co] = w1[dy,dx,ci,co]
    w1band = jnp.stack([
        sum(jnp.kron(jnp.eye(W, k=1 - dx, dtype=jnp.float32), p["w1"][dy, dx])
            for dx in range(3))
        for dy in range(3)])                                  # (3, W*C, W*C)
    return dict(
        fc1x=jnp.tile(p["fc1_w"][:C], (W, 1)) * inv_hw,       # (W*C, R)
        fc1y=jnp.tile(p["fc1_w"][C:], (W, 1)) * inv_hw,
        fc1b=p["fc1_b"],                                      # (1, R)
        fc2x=jnp.tile(p["fc2_w"][:, :C], (1, W)),             # (R, W*C)
        fc2y=jnp.tile(p["fc2_w"][:, C:], (1, W)),
        fc2bx=jnp.tile(p["fc2_b"][:, :C], (1, W)),            # (1, W*C)
        fc2by=jnp.tile(p["fc2_b"][:, C:], (1, W)),
        w0x=jnp.kron(eye_w, p["w0"][:C]),                     # (W*C, W*C) block-diag
        w0y=jnp.kron(eye_w, p["w0"][C:]),
        b0=jnp.tile(p["b0"], (1, W)),                         # (1, W*C)
        w1band=w1band,
        b1=jnp.tile(p["b1"], (1, W)),                         # (1, W*C)
    )


# ------------------------------- wrapper --------------------------------------


def _pick_batch_block(N, max_nb=8):
    nb = min(N, max_nb)
    while N % nb:
        nb -= 1
    return nb


def compare_diff_se(x, y, params, td=True):
    N, H, W, C = x.shape
    WC = W * C
    R = params["fc1_w"].shape[1]
    NB = _pick_batch_block(N)
    ep = _expand_params(params, H, W)
    kern = functools.partial(_kernel, NB=NB, H=H, WC=WC, td=td)

    def fixed(shape):
        return pl.BlockSpec(shape, lambda b: (0,) * len(shape))

    grid_spec = pltpu.PrefetchScalarGridSpec(
        num_scalar_prefetch=0,
        grid=(N // NB,),
        in_specs=[
            pl.BlockSpec((NB, H, WC), lambda b: (b, 0, 0)),   # x (lane-dense)
            pl.BlockSpec((NB, H, WC), lambda b: (b, 0, 0)),   # y
            fixed((WC, R)), fixed((WC, R)), fixed((1, R)),    # SE fc1 (expanded)
            fixed((R, WC)), fixed((R, WC)),                   # SE fc2 (expanded)
            fixed((1, WC)), fixed((1, WC)),                   # SE fc2 bias halves
            fixed((WC, WC)), fixed((WC, WC)), fixed((1, WC)), # conv0 (block-diag) + bias
            fixed((3, WC, WC)), fixed((1, WC)),               # conv1 band weights + bias
        ],
        out_specs=pl.BlockSpec((NB, H, WC), lambda b: (b, 0, 0)),
    )
    out = pl.pallas_call(
        kern,
        out_shape=jax.ShapeDtypeStruct((N, H, WC), jnp.float32),
        grid_spec=grid_spec,
        compiler_params=pltpu.CompilerParams(dimension_semantics=("parallel",)),
    )(x.reshape(N, H, WC), y.reshape(N, H, WC),
      ep["fc1x"], ep["fc1y"], ep["fc1b"],
      ep["fc2x"], ep["fc2y"], ep["fc2bx"], ep["fc2by"],
      ep["w0x"], ep["w0y"], ep["b0"],
      ep["w1band"], ep["b1"])
    return out.reshape(N, H, W, C)


# ---------------------------- pure-JAX reference -------------------------------


def reference_forward(x, y, p, td=True):
    N, H, W, C = x.shape
    if td:
        cat = jnp.concatenate([x, y], axis=-1)                       # (N,H,W,2C)
        s = jnp.mean(cat, axis=(1, 2), keepdims=True)                # (N,1,1,2C)
        s1 = jax.nn.relu(jnp.einsum("nhwc,cr->nhwr", s, p["fc1_w"]) + p["fc1_b"][None, None])
        s2 = jax.nn.sigmoid(jnp.einsum("nhwr,rc->nhwc", s1, p["fc2_w"]) + p["fc2_b"][None, None])
        se = cat * s2
        attn = jnp.einsum("nhwc,co->nhwo", se, p["w0"]) + p["b0"][None, None]
        u, v = x * attn, y * attn
    else:
        u, v = x, y

    def conv3(z):
        zp = jnp.pad(z, ((0, 0), (1, 1), (1, 1), (0, 0)))
        out = jnp.zeros((N, H, W, C), jnp.float32) + p["b1"][None, None]
        for dy in range(3):
            for dx in range(3):
                out = out + jnp.einsum("nhwc,co->nhwo",
                                       zp[:, dy:dy + H, dx:dx + W, :], p["w1"][dy, dx])
        return jax.nn.relu(out)

    return jnp.abs(conv3(u) - conv3(v))


# --------------------------------- main ----------------------------------------


def init_params(key, dim):
    C, C2 = dim, 2 * dim
    R = make_divisible(C2 / 16.0, 8, round_limit=0.0)   # timm SE reduced channels
    ks = jax.random.split(key, 8)

    def w(k, shape, scale):
        return (scale * jax.random.normal(k, shape)).astype(jnp.float32)

    params = dict(
        fc1_w=w(ks[0], (C2, R), 0.3), fc1_b=w(ks[1], (1, R), 0.1),
        fc2_w=w(ks[2], (R, C2), 0.3), fc2_b=w(ks[3], (1, C2), 0.1),
        w0=w(ks[4], (C2, C), 0.3),    b0=w(ks[5], (1, C), 0.1),
        w1=w(ks[6], (3, 3, C, C), 0.2), b1=w(ks[7], (1, C), 0.1),
    )
    return params


if __name__ == "__main__":
    N, C, H, W = 2, 8, 16, 16          # NCHW [2, 8, 16, 16]  -> kernel NHWC [2, 16, 16, 8]
    key = jax.random.PRNGKey(0)
    kx, ky, kp = jax.random.split(key, 3)
    x = jax.random.normal(kx, (N, H, W, C), jnp.float32)
    y = jax.random.normal(ky, (N, H, W, C), jnp.float32)
    params = init_params(kp, C)

    # td=True path (the module default)
    out = compare_diff_se(x, y, params, td=True)
    out = jax.block_until_ready(out)
    ref = reference_forward(x, y, params, td=True)
    np.testing.assert_allclose(np.asarray(out), np.asarray(ref), rtol=5e-3, atol=5e-3)

    # td=False path (forward_ed)
    out_ed = compare_diff_se(x, y, params, td=False)
    out_ed = jax.block_until_ready(out_ed)
    ref_ed = reference_forward(x, y, params, td=False)
    np.testing.assert_allclose(np.asarray(out_ed), np.asarray(ref_ed), rtol=5e-3, atol=5e-3)

    print("KERNEL_OK")
</pallas_src>

<mosaic_0001>
module attributes {stable_mosaic.version = 11 : i64} {
  func.func @_kernel(%arg0: i32, %arg1: memref<2x16x128xf32, #tpu.memory_space<vmem>>, %arg2: memref<2x16x128xf32, #tpu.memory_space<vmem>>, %arg3: memref<128x8xf32, #tpu.memory_space<vmem>>, %arg4: memref<128x8xf32, #tpu.memory_space<vmem>>, %arg5: memref<1x8xf32, #tpu.memory_space<vmem>>, %arg6: memref<8x128xf32, #tpu.memory_space<vmem>>, %arg7: memref<8x128xf32, #tpu.memory_space<vmem>>, %arg8: memref<1x128xf32, #tpu.memory_space<vmem>>, %arg9: memref<1x128xf32, #tpu.memory_space<vmem>>, %arg10: memref<128x128xf32, #tpu.memory_space<vmem>>, %arg11: memref<128x128xf32, #tpu.memory_space<vmem>>, %arg12: memref<1x128xf32, #tpu.memory_space<vmem>>, %arg13: memref<3x128x128xf32, #tpu.memory_space<vmem>>, %arg14: memref<1x128xf32, #tpu.memory_space<vmem>>, %arg15: memref<2x16x128xf32, #tpu.memory_space<vmem>>) attributes {dimension_semantics = [#tpu.dimension_semantics<parallel>], iteration_bounds = array<i64: 1>, scalar_prefetch = 0 : i64, scratch_operands = 0 : i64, tpu.core_type = #tpu.core_type<tc>, window_params = [{transform_indices = @transform_0, window_bounds = array<i64: 2, 16, 128>}, {transform_indices = @transform_1, window_bounds = array<i64: 2, 16, 128>}, {pipeline_mode = #tpu.pipeline_mode<synchronous>, transform_indices = @transform_2, window_bounds = array<i64: 128, 8>}, {pipeline_mode = #tpu.pipeline_mode<synchronous>, transform_indices = @transform_3, window_bounds = array<i64: 128, 8>}, {pipeline_mode = #tpu.pipeline_mode<synchronous>, transform_indices = @transform_4, window_bounds = array<i64: 1, 8>}, {pipeline_mode = #tpu.pipeline_mode<synchronous>, transform_indices = @transform_5, window_bounds = array<i64: 8, 128>}, {pipeline_mode = #tpu.pipeline_mode<synchronous>, transform_indices = @transform_6, window_bounds = array<i64: 8, 128>}, {pipeline_mode = #tpu.pipeline_mode<synchronous>, transform_indices = @transform_7, window_bounds = array<i64: 1, 128>}, {pipeline_mode = #tpu.pipeline_mode<synchronous>, transform_indices = @transform_8, window_bounds = array<i64: 1, 128>}, {pipeline_mode = #tpu.pipeline_mode<synchronous>, transform_indices = @transform_9, window_bounds = array<i64: 128, 128>}, {pipeline_mode = #tpu.pipeline_mode<synchronous>, transform_indices = @transform_10, window_bounds = array<i64: 128, 128>}, {pipeline_mode = #tpu.pipeline_mode<synchronous>, transform_indices = @transform_11, window_bounds = array<i64: 1, 128>}, {pipeline_mode = #tpu.pipeline_mode<synchronous>, transform_indices = @transform_12, window_bounds = array<i64: 3, 128, 128>}, {pipeline_mode = #tpu.pipeline_mode<synchronous>, transform_indices = @transform_13, window_bounds = array<i64: 1, 128>}, {transform_indices = @transform_14, window_bounds = array<i64: 2, 16, 128>}]} {
    %c0 = arith.constant 0 : index
    %c0_0 = arith.constant 0 : index
    %c0_1 = arith.constant 0 : index
    %0 = vector.load %arg1[%c0, %c0_0, %c0_1] : memref<2x16x128xf32, #tpu.memory_space<vmem>>, vector<2x16x128xf32>
    %c0_2 = arith.constant 0 : index
    %c0_3 = arith.constant 0 : index
    %c0_4 = arith.constant 0 : index
    %1 = vector.load %arg2[%c0_2, %c0_3, %c0_4] : memref<2x16x128xf32, #tpu.memory_space<vmem>>, vector<2x16x128xf32>
    %2 = vector.shape_cast %0 : vector<2x16x128xf32> to vector<32x128xf32>
    %3 = vector.shape_cast %1 : vector<2x16x128xf32> to vector<32x128xf32>
    %cst = arith.constant dense<0.000000e+00> : vector<2x128xf32>
    %4 = vector.multi_reduction <add>, %0, %cst [1] : vector<2x16x128xf32> to vector<2x128xf32>
    %cst_5 = arith.constant dense<0.000000e+00> : vector<2x128xf32>
    %5 = vector.multi_reduction <add>, %1, %cst_5 [1] : vector<2x16x128xf32> to vector<2x128xf32>
    %c0_6 = arith.constant 0 : index
    %c0_7 = arith.constant 0 : index
    %6 = vector.load %arg3[%c0_6, %c0_7] : memref<128x8xf32, #tpu.memory_space<vmem>>, vector<128x8xf32>
    %cst_8 = arith.constant dense<0.000000e+00> : vector<2x8xf32>
    %7 = tpu.matmul %4, %6, %cst_8 {dimension_numbers = #tpu.dot_dimension_numbers<[1], [0], [0], [1], [0, 0, 1, 1], [], []>} : vector<2x128xf32>, vector<128x8xf32>, vector<2x8xf32> -> vector<2x8xf32>
    %c0_9 = arith.constant 0 : index
    %c0_10 = arith.constant 0 : index
    %8 = vector.load %arg4[%c0_9, %c0_10] : memref<128x8xf32, #tpu.memory_space<vmem>>, vector<128x8xf32>
    %cst_11 = arith.constant dense<0.000000e+00> : vector<2x8xf32>
    %9 = tpu.matmul %5, %8, %cst_11 {dimension_numbers = #tpu.dot_dimension_numbers<[1], [0], [0], [1], [0, 0, 1, 1], [], []>} : vector<2x128xf32>, vector<128x8xf32>, vector<2x8xf32> -> vector<2x8xf32>
    %10 = arith.addf %7, %9 : vector<2x8xf32>
    %c0_12 = arith.constant 0 : index
    %c0_13 = arith.constant 0 : index
    %11 = vector.load %arg5[%c0_12, %c0_13] : memref<1x8xf32, #tpu.memory_space<vmem>>, vector<1x8xf32>
    %12 = vector.broadcast %11 : vector<1x8xf32> to vector<2x8xf32>
    %13 = arith.addf %10, %12 : vector<2x8xf32>
    %cst_14 = arith.constant 0.000000e+00 : f32
    %14 = vector.broadcast %cst_14 : f32 to vector<2x8xf32>
    %15 = arith.maximumf %13, %14 : vector<2x8xf32>
    %c0_15 = arith.constant 0 : index
    %c0_16 = arith.constant 0 : index
    %16 = vector.load %arg6[%c0_15, %c0_16] : memref<8x128xf32, #tpu.memory_space<vmem>>, vector<8x128xf32>
    %cst_17 = arith.constant dense<0.000000e+00> : vector<2x128xf32>
    %17 = tpu.matmul %15, %16, %cst_17 {dimension_numbers = #tpu.dot_dimension_numbers<[1], [0], [0], [1], [0, 0, 1, 1], [], []>} : vector<2x8xf32>, vector<8x128xf32>, vector<2x128xf32> -> vector<2x128xf32>
    %c0_18 = arith.constant 0 : index
    %c0_19 = arith.constant 0 : index
    %18 = vector.load %arg8[%c0_18, %c0_19] : memref<1x128xf32, #tpu.memory_space<vmem>>, vector<1x128xf32>
    %19 = vector.broadcast %18 : vector<1x128xf32> to vector<2x128xf32>
    %20 = arith.addf %17, %19 : vector<2x128xf32>
    %21 = arith.negf %20 : vector<2x128xf32>
    %22 = math.exp %21 : vector<2x128xf32>
    %cst_20 = arith.constant 1.000000e+00 : f32
    %23 = vector.broadcast %cst_20 : f32 to vector<2x128xf32>
    %24 = arith.addf %23, %22 : vector<2x128xf32>
    %25 = arith.divf %23, %24 : vector<2x128xf32>
    %c0_21 = arith.constant 0 : index
    %c0_22 = arith.constant 0 : index
    %26 = vector.load %arg7[%c0_21, %c0_22] : memref<8x128xf32, #tpu.memory_space<vmem>>, vector<8x128xf32>
    %cst_23 = arith.constant dense<0.000000e+00> : vector<2x128xf32>
    %27 = tpu.matmul %15, %26, %cst_23 {dimension_numbers = #tpu.dot_dimension_numbers<[1], [0], [0], [1], [0, 0, 1, 1], [], []>} : vector<2x8xf32>, vector<8x128xf32>, vector<2x128xf32> -> vector<2x128xf32>
    %c0_24 = arith.constant 0 : index
    %c0_25 = arith.constant 0 : index
    %28 = vector.load %arg9[%c0_24, %c0_25] : memref<1x128xf32, #tpu.memory_space<vmem>>, vector<1x128xf32>
    %29 = vector.broadcast %28 : vector<1x128xf32> to vector<2x128xf32>
    %30 = arith.addf %27, %29 : vector<2x128xf32>
    %31 = arith.negf %30 : vector<2x128xf32>
    %32 = math.exp %31 : vector<2x128xf32>
    %cst_26 = arith.constant 1.000000e+00 : f32
    %33 = vector.broadcast %cst_26 : f32 to vector<2x128xf32>
    %34 = arith.addf %33, %32 : vector<2x128xf32>
    %35 = arith.divf %33, %34 : vector<2x128xf32>
    %36 = vector.shape_cast %25 : vector<2x128xf32> to vector<2x1x128xf32>
    %37 = vector.broadcast %36 : vector<2x1x128xf32> to vector<2x16x128xf32>
    %38 = arith.mulf %0, %37 : vector<2x16x128xf32>
    %39 = vector.shape_cast %38 : vector<2x16x128xf32> to vector<32x128xf32>
    %40 = vector.shape_cast %35 : vector<2x128xf32> to vector<2x1x128xf32>
    %41 = vector.broadcast %40 : vector<2x1x128xf32> to vector<2x16x128xf32>
    %42 = arith.mulf %1, %41 : vector<2x16x128xf32>
    %43 = vector.shape_cast %42 : vector<2x16x128xf32> to vector<32x128xf32>
    %c0_27 = arith.constant 0 : index
    %c0_28 = arith.constant 0 : index
    %44 = vector.load %arg10[%c0_27, %c0_28] : memref<128x128xf32, #tpu.memory_space<vmem>>, vector<128x128xf32>
    %cst_29 = arith.constant dense<0.000000e+00> : vector<32x128xf32>
    %45 = tpu.matmul %39, %44, %cst_29 {dimension_numbers = #tpu.dot_dimension_numbers<[1], [0], [0], [1], [0, 0, 1, 1], [], []>} : vector<32x128xf32>, vector<128x128xf32>, vector<32x128xf32> -> vector<32x128xf32>
    %c0_30 = arith.constant 0 : index
    %c0_31 = arith.constant 0 : index
    %46 = vector.load %arg11[%c0_30, %c0_31] : memref<128x128xf32, #tpu.memory_space<vmem>>, vector<128x128xf32>
    %cst_32 = arith.constant dense<0.000000e+00> : vector<32x128xf32>
    %47 = tpu.matmul %43, %46, %cst_32 {dimension_numbers = #tpu.dot_dimension_numbers<[1], [0], [0], [1], [0, 0, 1, 1], [], []>} : vector<32x128xf32>, vector<128x128xf32>, vector<32x128xf32> -> vector<32x128xf32>
    %48 = arith.addf %45, %47 : vector<32x128xf32>
    %c0_33 = arith.constant 0 : index
    %c0_34 = arith.constant 0 : index
    %49 = vector.load %arg12[%c0_33, %c0_34] : memref<1x128xf32, #tpu.memory_space<vmem>>, vector<1x128xf32>
    %50 = vector.broadcast %49 : vector<1x128xf32> to vector<32x128xf32>
    %51 = arith.addf %48, %50 : vector<32x128xf32>
    %52 = arith.mulf %2, %51 : vector<32x128xf32>
    %53 = arith.mulf %3, %51 : vector<32x128xf32>
    %54 = vector.shape_cast %52 : vector<32x128xf32> to vector<2x16x128xf32>
    %55 = vector.shape_cast %53 : vector<32x128xf32> to vector<2x16x128xf32>
    %56 = tpu.concatenate %54, %55 in 0 : vector<2x16x128xf32>, vector<2x16x128xf32> -> vector<4x16x128xf32>
    %cst_35 = arith.constant 0.000000e+00 : f32
    %57 = vector.broadcast %cst_35 : f32 to vector<4x1x128xf32>
    %58 = vector.extract_strided_slice %56 {offsets = [0, 0, 0], sizes = [4, 15, 128], strides = [1, 1, 1]} : vector<4x16x128xf32> to vector<4x15x128xf32>
    %59 = tpu.concatenate %57, %58 in 1 : vector<4x1x128xf32>, vector<4x15x128xf32> -> vector<4x16x128xf32>
    %60 = vector.extract_strided_slice %56 {offsets = [0, 1, 0], sizes = [4, 15, 128], strides = [1, 1, 1]} : vector<4x16x128xf32> to vector<4x15x128xf32>
    %61 = tpu.concatenate %60, %57 in 1 : vector<4x15x128xf32>, vector<4x1x128xf32> -> vector<4x16x128xf32>
    %62 = vector.shape_cast %59 : vector<4x16x128xf32> to vector<64x128xf32>
    %c0_36 = arith.constant 0 : index
    %c0_37 = arith.constant 0 : index
    %c0_38 = arith.constant 0 : index
    %63 = vector.load %arg13[%c0_36, %c0_37, %c0_38] : memref<3x128x128xf32, #tpu.memory_space<vmem>>, vector<1x128x128xf32>
    %64 = vector.shape_cast %63 : vector<1x128x128xf32> to vector<128x128xf32>
    %cst_39 = arith.constant dense<0.000000e+00> : vector<64x128xf32>
    %65 = tpu.matmul %62, %64, %cst_39 {dimension_numbers = #tpu.dot_dimension_numbers<[1], [0], [0], [1], [0, 0, 1, 1], [], []>} : vector<64x128xf32>, vector<128x128xf32>, vector<64x128xf32> -> vector<64x128xf32>
    %66 = vector.shape_cast %56 : vector<4x16x128xf32> to vector<64x128xf32>
    %c1 = arith.constant 1 : index
    %c0_40 = arith.constant 0 : index
    %c0_41 = arith.constant 0 : index
    %67 = vector.load %arg13[%c1, %c0_40, %c0_41] : memref<3x128x128xf32, #tpu.memory_space<vmem>>, vector<1x128x128xf32>
    %68 = vector.shape_cast %67 : vector<1x128x128xf32> to vector<128x128xf32>
    %cst_42 = arith.constant dense<0.000000e+00> : vector<64x128xf32>
    %69 = tpu.matmul %66, %68, %cst_42 {dimension_numbers = #tpu.dot_dimension_numbers<[1], [0], [0], [1], [0, 0, 1, 1], [], []>} : vector<64x128xf32>, vector<128x128xf32>, vector<64x128xf32> -> vector<64x128xf32>
    %70 = arith.addf %65, %69 : vector<64x128xf32>
    %71 = vector.shape_cast %61 : vector<4x16x128xf32> to vector<64x128xf32>
    %c2 = arith.constant 2 : index
    %c0_43 = arith.constant 0 : index
    %c0_44 = arith.constant 0 : index
    %72 = vector.load %arg13[%c2, %c0_43, %c0_44] : memref<3x128x128xf32, #tpu.memory_space<vmem>>, vector<1x128x128xf32>
    %73 = vector.shape_cast %72 : vector<1x128x128xf32> to vector<128x128xf32>
    %cst_45 = arith.constant dense<0.000000e+00> : vector<64x128xf32>
    %74 = tpu.matmul %71, %73, %cst_45 {dimension_numbers = #tpu.dot_dimension_numbers<[1], [0], [0], [1], [0, 0, 1, 1], [], []>} : vector<64x128xf32>, vector<128x128xf32>, vector<64x128xf32> -> vector<64x128xf32>
    %75 = arith.addf %70, %74 : vector<64x128xf32>
    %c0_46 = arith.constant 0 : index
    %c0_47 = arith.constant 0 : index
    %76 = vector.load %arg14[%c0_46, %c0_47] : memref<1x128xf32, #tpu.memory_space<vmem>>, vector<1x128xf32>
    %77 = vector.broadcast %76 : vector<1x128xf32> to vector<64x128xf32>
    %78 = arith.addf %75, %77 : vector<64x128xf32>
    %cst_48 = arith.constant 0.000000e+00 : f32
    %79 = vector.broadcast %cst_48 : f32 to vector<64x128xf32>
    %80 = arith.maximumf %78, %79 : vector<64x128xf32>
    %81 = vector.extract_strided_slice %80 {offsets = [0, 0], sizes = [32, 128], strides = [1, 1]} : vector<64x128xf32> to vector<32x128xf32>
    %82 = vector.extract_strided_slice %80 {offsets = [32, 0], sizes = [32, 128], strides = [1, 1]} : vector<64x128xf32> to vector<32x128xf32>
    %83 = arith.subf %81, %82 : vector<32x128xf32>
    %84 = math.absf %83 : vector<32x128xf32>
    %85 = vector.shape_cast %84 : vector<32x128xf32> to vector<2x16x128xf32>
    %c0_49 = arith.constant 0 : index
    %c0_50 = arith.constant 0 : index
    %c0_51 = arith.constant 0 : index
    %86 = vector.load %arg15[%c0_49, %c0_50, %c0_51] : memref<2x16x128xf32, #tpu.memory_space<vmem>>, vector<2x16x128xf32>
    tpu.vector_store %arg15[%c0_49, %c0_50, %c0_51], %85 {strides = array<i32>} : memref<2x16x128xf32, #tpu.memory_space<vmem>>, vector<2x16x128xf32>,
    return
  }
  func.func @transform_0(%arg0: i32) -> (i32, i32, i32) {
    %c0_i32 = arith.constant 0 : i32
    %c0_i32_0 = arith.constant 0 : i32
    %c0_i32_1 = arith.constant 0 : i32
    return %arg0, %c0_i32, %c0_i32_0 : i32, i32, i32
  }
  func.func @transform_1(%arg0: i32) -> (i32, i32, i32) {
    %c0_i32 = arith.constant 0 : i32
    %c0_i32_0 = arith.constant 0 : i32
    %c0_i32_1 = arith.constant 0 : i32
    return %arg0, %c0_i32, %c0_i32_0 : i32, i32, i32
  }
  func.func @transform_2(%arg0: i32) -> (i32, i32) {
    %c0_i32 = arith.constant 0 : i32
    %c0_i32_0 = arith.constant 0 : i32
    %c0_i32_1 = arith.constant 0 : i32
    return %c0_i32, %c0_i32_0 : i32, i32
  }
  func.func @transform_3(%arg0: i32) -> (i32, i32) {
    %c0_i32 = arith.constant 0 : i32
    %c0_i32_0 = arith.constant 0 : i32
    %c0_i32_1 = arith.constant 0 : i32
    return %c0_i32, %c0_i32_0 : i32, i32
  }
  func.func @transform_4(%arg0: i32) -> (i32, i32) {
    %c0_i32 = arith.constant 0 : i32
    %c0_i32_0 = arith.constant 0 : i32
    %c0_i32_1 = arith.constant 0 : i32
    return %c0_i32, %c0_i32_0 : i32, i32
  }
  func.func @transform_5(%arg0: i32) -> (i32, i32) {
    %c0_i32 = arith.constant 0 : i32
    %c0_i32_0 = arith.constant 0 : i32
    %c0_i32_1 = arith.constant 0 : i32
    return %c0_i32, %c0_i32_0 : i32, i32
  }
  func.func @transform_6(%arg0: i32) -> (i32, i32) {
    %c0_i32 = arith.constant 0 : i32
    %c0_i32_0 = arith.constant 0 : i32
    %c0_i32_1 = arith.constant 0 : i32
    return %c0_i32, %c0_i32_0 : i32, i32
  }
  func.func @transform_7(%arg0: i32) -> (i32, i32) {
    %c0_i32 = arith.constant 0 : i32
    %c0_i32_0 = arith.constant 0 : i32
    %c0_i32_1 = arith.constant 0 : i32
    return %c0_i32, %c0_i32_0 : i32, i32
  }
  func.func @transform_8(%arg0: i32) -> (i32, i32) {
    %c0_i32 = arith.constant 0 : i32
    %c0_i32_0 = arith.constant 0 : i32
    %c0_i32_1 = arith.constant 0 : i32
    return %c0_i32, %c0_i32_0 : i32, i32
  }
  func.func @transform_9(%arg0: i32) -> (i32, i32) {
    %c0_i32 = arith.constant 0 : i32
    %c0_i32_0 = arith.constant 0 : i32
    %c0_i32_1 = arith.constant 0 : i32
    return %c0_i32, %c0_i32_0 : i32, i32
  }
  func.func @transform_10(%arg0: i32) -> (i32, i32) {
    %c0_i32 = arith.constant 0 : i32
    %c0_i32_0 = arith.constant 0 : i32
    %c0_i32_1 = arith.constant 0 : i32
    return %c0_i32, %c0_i32_0 : i32, i32
  }
  func.func @transform_11(%arg0: i32) -> (i32, i32) {
    %c0_i32 = arith.constant 0 : i32
    %c0_i32_0 = arith.constant 0 : i32
    %c0_i32_1 = arith.constant 0 : i32
    return %c0_i32, %c0_i32_0 : i32, i32
  }
  func.func @transform_12(%arg0: i32) -> (i32, i32, i32) {
    %c0_i32 = arith.constant 0 : i32
    %c0_i32_0 = arith.constant 0 : i32
    %c0_i32_1 = arith.constant 0 : i32
    %c0_i32_2 = arith.constant 0 : i32
    return %c0_i32, %c0_i32_0, %c0_i32_1 : i32, i32, i32
  }
  func.func @transform_13(%arg0: i32) -> (i32, i32) {
    %c0_i32 = arith.constant 0 : i32
    %c0_i32_0 = arith.constant 0 : i32
    %c0_i32_1 = arith.constant 0 : i32
    return %c0_i32, %c0_i32_0 : i32, i32
  }
  func.func @transform_14(%arg0: i32) -> (i32, i32, i32) {
    %c0_i32 = arith.constant 0 : i32
    %c0_i32_0 = arith.constant 0 : i32
    %c0_i32_1 = arith.constant 0 : i32
    return %arg0, %c0_i32, %c0_i32_0 : i32, i32, i32
  }
}

</mosaic_0001>

<bundles_post_ra>
// kernel: tpu_custom_call.1
= control target key start
LH: loop header
LB: loop body
LE: loop exit
PB: predicated region body
PF: predicated region fallthrough
CT: control target
= control target key end

     0   :  { %19 = vsyncpa [#allocation3], 0  ;;  %s1290_s0 = inlined_call_operand.hbm [shape: f32[2,16,128], index: 0, kind: input, shape index: {}]   ;;  %s1291_s1 = inlined_call_operand.hbm [shape: f32[2,16,128], index: 1, kind: input, shape index: {}]   ;;  %s1292_s2 = inlined_call_operand.vmem [shape: f32[128,8], index: 2, kind: input, shape index: {}]   ;;  %s1293_s3 = inlined_call_operand.vmem [shape: f32[128,8], index: 3, kind: input, shape index: {}]   ;;  %s1294_s4 = inlined_call_operand.vmem [shape: f32[1,8], index: 4, kind: input, shape index: {}]   ;;  %s1295_s5 = inlined_call_operand.vmem [shape: f32[8,128], index: 5, kind: input, shape index: {}]   ;;  %s1296_s6 = inlined_call_operand.hbm [shape: f32[8,128], index: 6, kind: input, shape index: {}]   ;;  %s1297_s7 = inlined_call_operand.vmem [shape: f32[1,128], index: 7, kind: input, shape index: {}]   ;;  %s1298_s8 = inlined_call_operand.vmem [shape: f32[1,128], index: 8, kind: input, shape index: {}]   ;;  %s1299_s9 = inlined_call_operand.vmem [shape: f32[128,128], index: 9, kind: input, shape index: {}]   ;;  %s1300_s10 = inlined_call_operand.vmem [shape: f32[128,128], index: 10, kind: input, shape index: {}]   ;;  %s1301_s11 = inlined_call_operand.vmem [shape: f32[1,128], index: 11, kind: input, shape index: {}]   ;;  %s1302_s12 = inlined_call_operand.hbm [shape: f32[3,128,128], index: 12, kind: input, shape index: {}]   ;;  %s1303_s13 = inlined_call_operand.vmem [shape: f32[1,128], index: 13, kind: input, shape index: {}]   ;;  %s1304_s14 = inlined_call_operand.hbm [shape: f32[2,16,128], index: 14, kind: output, shape index: {}]  }
   0x1   :  { %20 = vsyncpa [#allocation6], 0 }
   0x2   :  { %21 = vsyncpa [#allocation9], 0 }
   0x3   :  { %22 = vsyncpa [#allocation4], 0  ;;  %s40_s15 = sshll.u32 %s1291_s1, 4  ;;  %s906_s16 = smov [#allocation5]   ;;  %s41_s15 = int_to_ptr.hbm [resolvable:$true] %s40_s15 }
   0x4   :  { %s42_s17 = sshll.u32 %s906_s16, 4  ;;  %s27_s20 = sshll.u32 %s1290_s0, 4  ;;  %s43_s17 = int_to_ptr.vmem [resolvable:$true] %s42_s17  ;;  %s28_s20 = int_to_ptr.hbm [resolvable:$true] %s27_s20 }
   0x5   :  { %s907_s21 = smov 128   ;;  %s908_s22 = smov 8  }
   0x6   :  { %48 = dma.hbm_to_vmem [thread:$0]  %s41_s15, 512, %s43_s17, [#allocation6], %s907_s21, %s907_s21, %s908_s22  }
   0x7   :  { %s909_s23 = smov [#allocation2]   ;;  %s62_s1 = sshll.u32 %s1296_s6, 4  ;;  %s63_s1 = int_to_ptr.hbm [resolvable:$true] %s62_s1 }
   0x8   :  { %s29_s24 = sshll.u32 %s909_s23, 4  ;;  %s82_s28 = sshll.u32 %s1302_s12, 4  ;;  %s30_s24 = int_to_ptr.vmem [resolvable:$true] %s29_s24  ;;  %s83_s28 = int_to_ptr.hbm [resolvable:$true] %s82_s28 }
   0x9   :  { %35 = dma.hbm_to_vmem [thread:$0]  %s28_s20, 512, %s30_s24, [#allocation3], %s907_s21, %s907_s21, %s908_s22  }
   0xa   :  { %s910_s29 = smov [#allocation7]   ;;  %s911_s15 = smov [#allocation8]  }
   0xb   :  { %s64_s30 = sshll.u32 %s910_s29, 4  ;;  %s84_s16 = sshll.u32 %s911_s15, 4  ;;  %s65_s30 = int_to_ptr.vmem [resolvable:$true] %s64_s30  ;;  %s85_s16 = int_to_ptr.vmem [resolvable:$true] %s84_s16 }
   0xc   :  { %67 = dma.hbm_to_vmem [thread:$0]  %s63_s1, 128, %s65_s30, [#allocation6]  }
   0xd   :  { %90 = dma.hbm_to_vmem [thread:$0]  %s83_s28, 6144, %s85_s16, [#allocation9], %s907_s21, %s907_s21, %s908_s22  }
   0xe   :  { %898 = dma.done.wait [#allocation3], 512  }
   0xf   :  { %899 = vsyncadd [#allocation3], 4294966784 }
  0x10   :  { %900 = dma.done.wait [#allocation6], 640  }
  0x11   :  { %901 = vsyncadd [#allocation6], 4294966656 }
  0x12   :  { %902 = dma.done.wait [#allocation9], 6144  }
  0x13   :  { %903 = vsyncadd [#allocation9], 4294961152  ;;  %v176_v0 = vld [vmem:[%s1293_s3 + $0x78] sm:$0xff]  ;;  %v175_v2 = vld [vmem:[%s1293_s3 + $0x70] sm:$0xff]  ;;  %vm179_vm0 = vcmask 1041409   ;;  %vm237_vm1 = vcmask 64512  }
  0x14   :  { %v160_v1 = vld [vmem:[%s1292_s2 + $0x78] sm:$0xff]  ;;  %182 = vmatpush.msra.mxu0 %v176_v0  ;;  %v159_v3 = vld [vmem:[%s1292_s2 + $0x70] sm:$0xff]  ;;  %v174_v4 = vld [vmem:[%s1293_s3 + $0x68] sm:$0xff]  ;;  %vm458_vm10 = vcmask 1040384   ;;  %vm483_vm12 = vcmask 1046528   ;;  %s727_s28 = sshll.u32 %s1304_s14, 4  ;;  %s728_s28 = int_to_ptr.hbm [resolvable:$true] %s727_s28 }
  0x15   :  { %206 = vmatpush.msra.mxu1 %v160_v1  ;;  %v158_v5 = vld [vmem:[%s1292_s2 + $0x68] sm:$0xff]  ;;  %v173_v6 = vld [vmem:[%s1293_s3 + $0x60] sm:$0xff]  ;;  %v172_v8 = vld [vmem:[%s1293_s3 + $0x58] sm:$0xff] }
  0x16   :  { %183 = vmatpush.msra.mxu0 %v175_v2  ;;  %v157_v7 = vld [vmem:[%s1292_s2 + $0x60] sm:$0xff]  ;;  %v156_v9 = vld [vmem:[%s1292_s2 + $0x58] sm:$0xff]  ;;  %v171_v10 = vld [vmem:[%s1293_s3 + $0x50] sm:$0xff] }
  0x17   :  { %207 = vmatpush.msra.mxu1 %v159_v3  ;;  %v155_v11 = vld [vmem:[%s1292_s2 + $0x50] sm:$0xff]  ;;  %v170_v12 = vld [vmem:[%s1293_s3 + $0x48] sm:$0xff]  ;;  %v169_v14 = vld [vmem:[%s1293_s3 + $0x40] sm:$0xff] }
  0x18   :  { %184 = vmatpush.msra.mxu0 %v174_v4  ;;  %v154_v13 = vld [vmem:[%s1292_s2 + $0x48] sm:$0xff]  ;;  %v153_v15 = vld [vmem:[%s1292_s2 + $0x40] sm:$0xff]  ;;  %v1061_v18 = vld [vmem:[#allocation5 + $0x10] sm:$0xff] }
  0x19   :  { %208 = vmatpush.msra.mxu1 %v158_v5  ;;  %v1057_v16 = vld [vmem:[#allocation5] sm:$0xff]  ;;  %v1059_v17 = vld [vmem:[#allocation5 + $0x8] sm:$0xff]  ;;  %v1063_v19 = vld [vmem:[#allocation5 + $0x18] sm:$0xff] }
  0x1a   :  { %185 = vmatpush.msra.mxu0 %v173_v6  ;;  %v168_v20 = vld [vmem:[%s1293_s3 + $0x38] sm:$0xff]  ;;  %v131_v22 = vadd.f32 %v1059_v17, %v1057_v16  ;;  %v138_v23 = vadd.f32 %v1063_v19, %v1061_v18  ;;  %v1075_v24 = vld [vmem:[#allocation2] sm:$0xff]  ;;  %v1077_v25 = vld [vmem:[#allocation2 + $0x8] sm:$0xff] }
  0x1b   :  { %209 = vmatpush.msra.mxu1 %v157_v7  ;;  %v152_v21 = vld [vmem:[%s1292_s2 + $0x38] sm:$0xff]  ;;  %v1079_v26 = vld [vmem:[#allocation2 + $0x10] sm:$0xff]  ;;  %v117_v28 = vadd.f32 %v1077_v25, %v1075_v24  ;;  %v166_v39 = vld [vmem:[%s1293_s3 + $0x28] sm:$0xff] }
  0x1c   :  { %186 = vmatpush.msra.mxu0 %v172_v8  ;;  %v1081_v27 = vld [vmem:[#allocation2 + $0x18] sm:$0xff]  ;;  %v132_v29 = vrot.slane %v131_v22, 4  ;;  %v139_v30 = vrot.slane %v138_v23, 4  ;;  %v167_v33 = vld [vmem:[%s1293_s3 + $0x30] sm:$0xff]  ;;  %v150_v40 = vld [vmem:[%s1292_s2 + $0x28] sm:$0xff] }
  0x1d   :  { %210 = vmatpush.msra.mxu1 %v156_v9  ;;  %v124_v31 = vadd.f32 %v1081_v27, %v1079_v26  ;;  %v118_v32 = vrot.slane %v117_v28, 4  ;;  %v151_v34 = vld [vmem:[%s1292_s2 + $0x30] sm:$0xff]  ;;  %v165_v45 = vld [vmem:[%s1293_s3 + $0x20] sm:$0xff]  ;;  %v164_v51 = vld [vmem:[%s1293_s3 + $0x18] sm:$0xff] }
  0x1e   :  { %187 = vmatpush.msra.mxu0 %v171_v10  ;;  %v133_v35 = vadd.f32 %v132_v29, %v131_v22  ;;  %v140_v36 = vadd.f32 %v139_v30, %v138_v23  ;;  %v149_v46 = vld [vmem:[%s1292_s2 + $0x20] sm:$0xff]  ;;  %v148_v52 = vld [vmem:[%s1292_s2 + $0x18] sm:$0xff]  ;;  %v163_v57 = vld [vmem:[%s1293_s3 + $0x10] sm:$0xff] }
  0x1f   :  { %211 = vmatpush.msra.mxu1 %v155_v11  ;;  %v125_v37 = vrot.slane %v124_v31, 4  ;;  %v119_v38 = vadd.f32 %v118_v32, %v117_v28  ;;  %v147_v58 = vld [vmem:[%s1292_s2 + $0x10] sm:$0xff]  ;;  %v162_v63 = vld [vmem:[%s1293_s3 + $0x8] sm:$0xff]  ;;  %v161_v2 = vld [vmem:[%s1293_s3] sm:$0xff] }
  0x20   :  { %188 = vmatpush.msra.mxu0 %v170_v12  ;;  %v134_v41 = vrot.slane %v133_v35, 2  ;;  %v141_v42 = vrot.slane %v140_v36, 2  ;;  %v146_v0 = vld [vmem:[%s1292_s2 + $0x8] sm:$0xff]  ;;  %v145_v3 = vld [vmem:[%s1292_s2] sm:$0xff]  ;;  %v371_v22 = vld [vmem:[%s1300_s10 + $0x58] sm:$0xff] }
  0x21   :  { %212 = vmatpush.msra.mxu1 %v154_v13  ;;  %v126_v43 = vadd.f32 %v125_v37, %v124_v31  ;;  %v120_v44 = vrot.slane %v119_v38, 2  ;;  %v232_v6 = vld [vmem:[%s1295_s5] sm:$0xff]  ;;  %v370_v23 = vld [vmem:[%s1300_s10 + $0x50] sm:$0xff]  ;;  %v369_v28 = vld [vmem:[%s1300_s10 + $0x48] sm:$0xff] }
  0x22   :  { %189 = vmatpush.msra.mxu0 %v169_v14  ;;  %v135_v47 = vadd.f32 %v134_v41, %v133_v35  ;;  %v142_v48 = vadd.f32 %v141_v42, %v140_v36  ;;  %v280_v7 = vld [vmem:[#allocation7] sm:$0xff]  ;;  %256 = vmatpush.msra.mxu2 %v232_v6  ;;  %v375_v14 = vld [vmem:[%s1300_s10 + $0x78] sm:$0xff]  ;;  %v366_v31 = vld [vmem:[%s1300_s10 + $0x30] sm:$0xff] }
  0x23   :  { %213 = vmatpush.msra.mxu1 %v153_v15  ;;  %v127_v49 = vrot.slane %v126_v43, 2  ;;  %v121_v50 = vadd.f32 %v120_v44, %v119_v38  ;;  %300 = vmatpush.msra.mxu3 %v280_v7  ;;  %v765_v8 = vld [vmem:[%s1294_s4] ss:$0 sm:$0xff]  ;;  %v374_v15 = vld [vmem:[%s1300_s10 + $0x70] sm:$0xff]  ;;  %v367_v30 = vld [vmem:[%s1300_s10 + $0x38] sm:$0xff] }
  0x24   :  { %190 = vmatpush.msra.mxu0 %v168_v20  ;;  %v136_v53 = vrot.slane %v135_v47, 1  ;;  %v143_v54 = vrot.slane %v142_v48, 1  ;;  %v373_v20 = vld [vmem:[%s1300_s10 + $0x68] sm:$0xff]  ;;  %v368_v29 = vld [vmem:[%s1300_s10 + $0x40] sm:$0xff]  ;;  %v362_v35 = vld [vmem:[%s1300_s10 + $0x10] sm:$0xff] }
  0x25   :  { %214 = vmatpush.msra.mxu1 %v152_v21  ;;  %v128_v55 = vadd.f32 %v127_v49, %v126_v43  ;;  %v122_v56 = vrot.slane %v121_v50, 1  ;;  %376 = vmatpush.msrb.mxu3 %v375_v14  ;;  %v372_v21 = vld [vmem:[%s1300_s10 + $0x60] sm:$0xff]  ;;  %v365_v32 = vld [vmem:[%s1300_s10 + $0x28] sm:$0xff]  ;;  %v359_v42 = vld [vmem:[%s1299_s9 + $0x78] sm:$0xff] }
  0x26   :  { %191 = vmatpush.msra.mxu0 %v167_v33  ;;  %v137_v60 = vadd.f32 %v136_v53, %v135_v47  ;;  %v144_v61 = vadd.f32 %v143_v54, %v142_v48  ;;  %v364_v33 = vld [vmem:[%s1300_s10 + $0x20] sm:$0xff]  ;;  %v361_v37 = vld [vmem:[%s1300_s10 + $0x8] sm:$0xff]  ;;  %v358_v43 = vld [vmem:[%s1299_s9 + $0x70] sm:$0xff] }
  0x27   :  { %215 = vmatpush.msra.mxu1 %v151_v34  ;;  %v129_v59 = vrot.slane %v128_v55, 1  ;;  %v123_v62 = vadd.f32 %v122_v56, %v121_v50  ;;  %377 = vmatpush.msrb.mxu3 %v374_v15  ;;  %v363_v34 = vld [vmem:[%s1300_s10 + $0x18] sm:$0xff]  ;;  %v767_v36 = vld [vmem:[%s1298_s8] ss:$0 sm:$0xff]  ;;  %v353_v54 = vld [vmem:[%s1299_s9 + $0x48] sm:$0xff] }
  0x28   :  { %192 = vmatpush.msra.mxu0 %v166_v39  ;;  %v180_v4 = vsel %vm179_vm0, %v144_v61, %v137_v60  ;;  %v360_v39 = vld [vmem:[%s1300_s10] sm:$0xff]  ;;  %v355_v50 = vld [vmem:[%s1299_s9 + $0x58] sm:$0xff]  ;;  %v349_v60 = vld [vmem:[%s1299_s9 + $0x28] sm:$0xff] }
  0x29   :  { %216 = vmatpush.msra.mxu1 %v150_v40  ;;  %v130_v1 = vadd.f32 %v129_v59, %v128_v55  ;;  %378 = vmatpush.msrb.mxu3 %v373_v20  ;;  %v766_v44 = vld [vmem:[%s1297_s7] ss:$0 sm:$0xff]  ;;  %v351_v56 = vld [vmem:[%s1299_s9 + $0x38] sm:$0xff]  ;;  %v346_v6 = vld [vmem:[%s1299_s9 + $0x10] sm:$0xff] }
  0x2a   :  { %193 = vmatpush.msra.mxu0 %v165_v45  ;;  %v357_v45 = vld [vmem:[%s1299_s9 + $0x68] sm:$0xff]  ;;  %v356_v47 = vld [vmem:[%s1299_s9 + $0x60] sm:$0xff]  ;;  %vm1250_vm11 = vmneg %vm458_vm10 }
  0x2b   :  { %217 = vmatpush.msra.mxu1 %v149_v46  ;;  %v204_v5 = vsel %vm179_vm0, %v130_v1, %v123_v62  ;;  %379 = vmatpush.msrb.mxu3 %v372_v21  ;;  %v352_v55 = vld [vmem:[%s1299_s9 + $0x40] sm:$0xff] }
  0x2c   :  { %194 = vmatpush.msra.mxu0 %v164_v51  ;;  %v354_v51 = vld [vmem:[%s1299_s9 + $0x50] sm:$0xff] }
  0x2d   :  { %218 = vmatpush.msra.mxu1 %v148_v52  ;;  %380 = vmatpush.msrb.mxu3 %v371_v22 }
  0x2e   :  { %195 = vmatpush.msra.mxu0 %v163_v57  ;;  %v350_v57 = vld [vmem:[%s1299_s9 + $0x30] sm:$0xff] }
  0x2f   :  { %219 = vmatpush.msra.mxu1 %v147_v58  ;;  %381 = vmatpush.msrb.mxu3 %v370_v23 }
  0x30   :  { %196 = vmatpush.msra.mxu0 %v162_v63  ;;  %v348_v63 = vld [vmem:[%s1299_s9 + $0x20] sm:$0xff] }
  0x31   :  { %220 = vmatpush.msra.mxu1 %v146_v0  ;;  %382 = vmatpush.msrb.mxu3 %v369_v28 }
  0x32   :  { %197 = vmatpush.msra.mxu0 %v161_v2 }
  0x33   :  { %221 = vmatpush.msra.mxu1 %v145_v3  ;;  %198 = vmatmul.f32.vlgmr.msra.gmra.mxu0 %v180_v4 }
  0x34   :  { %222 = vmatmul.f32.vlgmr.msra.gmra.mxu1 %v204_v5  ;;  %383 = vmatpush.msrb.mxu3 %v368_v29  ;;  %v347_v5 = vld [vmem:[%s1299_s9 + $0x18] sm:$0xff] }
  0x36   :  { %384 = vmatpush.msrb.mxu3 %v367_v30 }
  0x38   :  { %385 = vmatpush.msrb.mxu3 %v366_v31 }
  0x3a   :  { %386 = vmatpush.msrb.mxu3 %v365_v32 }
  0x3c   :  { %387 = vmatpush.msrb.mxu3 %v364_v33 }
  0x3e   :  { %388 = vmatpush.msrb.mxu3 %v363_v34 }
  0x40   :  { %389 = vmatpush.msrb.mxu3 %v362_v35 }
  0x42   :  { %390 = vmatpush.msrb.mxu3 %v361_v37 }
  0x44   :  { %391 = vmatpush.msrb.mxu3 %v360_v39 }
  0xb0   :  { %v199_v9 = vpop.f32.mrf.mxu0 }
  0xb1   :  { %v223_v10 = vpop.f32.mrf.mxu1 }
  0xb2   :  { %v224_v11 = vadd.f32 %v223_v10, %v199_v9  ;;  %v345_v9 = vld [vmem:[%s1299_s9 + $0x8] sm:$0xff] }
  0xb4   :  { %v230_v12 = vadd.f32 %v765_v8, %v224_v11 }
  0xb6   :  { %v231_v13 = vmax.f32 %v230_v12, 0.0  ;;  %v344_v12 = vld [vmem:[%s1299_s9] sm:$0xff] }
  0xb8   :  { %742 = vmatmul.msk.f32.vlgmr.msra.gmra.mxu2 %vm237_vm1, %v231_v13  ;;  %744 = vmatmul.msk.f32.vlgmr.msra.gmra.mxu3 %vm237_vm1, %v231_v13 }
  0xb9   :  { %405 = vmatpush.msra.mxu3 %v359_v42 }
  0xbb   :  { %406 = vmatpush.msra.mxu3 %v358_v43 }
  0xbd   :  { %407 = vmatpush.msra.mxu3 %v357_v45  ;;  %v539_v45 = vld [vmem:[#allocation8 + $0xf0] sm:$0xff] }
  0xbf   :  { %408 = vmatpush.msra.mxu3 %v356_v47  ;;  %v538_v47 = vld [vmem:[#allocation8 + $0xe8] sm:$0xff] }
  0xc1   :  { %409 = vmatpush.msra.mxu3 %v355_v50  ;;  %v537_v50 = vld [vmem:[#allocation8 + $0xe0] sm:$0xff] }
  0xc3   :  { %410 = vmatpush.msra.mxu3 %v354_v51  ;;  %v536_v51 = vld [vmem:[#allocation8 + $0xd8] sm:$0xff] }
  0xc5   :  { %411 = vmatpush.msra.mxu3 %v353_v54  ;;  %v519_v54 = vld [vmem:[#allocation8 + $0x58] sm:$0xff] }
  0xc7   :  { %412 = vmatpush.msra.mxu3 %v352_v55  ;;  %v639_v55 = vld [vmem:[#allocation8 + $0x178] sm:$0xff] }
  0xc8   :  { %640 = vmatpush.msrb.mxu2 %v639_v55 }
  0xc9   :  { %413 = vmatpush.msra.mxu3 %v351_v56  ;;  %v534_v56 = vld [vmem:[#allocation8 + $0xc8] sm:$0xff] }
  0xcb   :  { %414 = vmatpush.msra.mxu3 %v350_v57  ;;  %v518_v57 = vld [vmem:[#allocation8 + $0x50] sm:$0xff] }
  0xcd   :  { %415 = vmatpush.msra.mxu3 %v349_v60  ;;  %v533_v60 = vld [vmem:[#allocation8 + $0xc0] sm:$0xff] }
  0xcf   :  { %416 = vmatpush.msra.mxu3 %v348_v63  ;;  %v516_v63 = vld [vmem:[#allocation8 + $0x40] sm:$0xff] }
  0xd1   :  { %417 = vmatpush.msra.mxu3 %v347_v5  ;;  %v514_v5 = vld [vmem:[#allocation8 + $0x30] sm:$0xff] }
  0xd3   :  { %418 = vmatpush.msra.mxu3 %v346_v6  ;;  %v634_v6 = vld [vmem:[#allocation8 + $0x150] sm:$0xff] }
  0xd5   :  { %419 = vmatpush.msra.mxu3 %v345_v9  ;;  %v633_v9 = vld [vmem:[#allocation8 + $0x148] sm:$0xff] }
  0xd7   :  { %420 = vmatpush.msra.mxu3 %v344_v12 }
 0x13b   :  { %v302_v38 = vpop.f32.mrf.mxu3  ;;  %v258_v46 = vpop.f32.mrf.mxu2 }
 0x13c   :  { %v303_v40 = vadd.f32 %v767_v36, %v302_v38  ;;  %v259_v48 = vadd.f32 %v766_v44, %v258_v46  ;;  %v540_v44 = vld [vmem:[#allocation8 + $0xf8] sm:$0xff] }
 0x13d   :  { %541 = vmatpush.msrb.mxu0 %v540_v44  ;;  %v523_v46 = vld [vmem:[#allocation8 + $0x78] sm:$0xff] }
 0x13e   :  { %v745_v41 = vmul.f32 -1.442695, %v303_v40  ;;  %v743_v53 = vmul.f32 -1.442695, %v259_v48  ;;  %582 = vmatpush.msrb.mxu1 %v523_v46  ;;  %v522_v48 = vld [vmem:[#allocation8 + $0x70] sm:$0xff] }
 0x13f   :  { %542 = vmatpush.msrb.mxu0 %v539_v45 }
 0x140   :  { %770 = vpow2.f32 %v745_v41  ;;  %583 = vmatpush.msrb.mxu1 %v522_v48 }
 0x141   :  { %543 = vmatpush.msrb.mxu0 %v538_v47 }
 0x143   :  { %544 = vmatpush.msrb.mxu0 %v537_v50 }
 0x145   :  { %545 = vmatpush.msrb.mxu0 %v536_v51 }
 0x146   :  { %v771_v49 = vpop.eup %770 }
 0x147   :  { %v308_v52 = vadd.f32 1.0, %v771_v49  ;;  %v521_v49 = vld [vmem:[#allocation8 + $0x68] sm:$0xff] }
 0x148   :  { %584 = vmatpush.msrb.mxu1 %v521_v49 }
 0x149   :  { %772 = vrcp.f32 %v308_v52  ;;  %v320_v0 = vand.u32 2147483648, %v308_v52  ;;  %v318_v2 = vand.u32 2147483647, %v308_v52  ;;  %vm314_vm3 = vweird.f32 %v308_v52 }
 0x14a   :  { %774 = vpow2.f32 %v743_v53  ;;  %v535_v53 = vld [vmem:[#allocation8 + $0xd0] sm:$0xff] }
 0x14b   :  { %v321_v7 = vor.u32 1.1754944e-38, %v320_v0  ;;  %vm319_vm5 = vcmp.eq.f32.partialorder %v318_v2, 8.507059e+37  ;;  %546 = vmatpush.msrb.mxu0 %v535_v53  ;;  %v636_v0 = vld [vmem:[#allocation8 + $0x160] sm:$0xff]  ;;  %v515_v2 = vld [vmem:[#allocation8 + $0x38] sm:$0xff] }
 0x14d   :  { %547 = vmatpush.msrb.mxu0 %v534_v56 }
 0x14f   :  { %v773_v58 = vpop.eup %772  ;;  %548 = vmatpush.msrb.mxu0 %v533_v60 }
 0x150   :  { %v310_v59 = vmul.f32 %v773_v58, %v308_v52  ;;  %v775_v61 = vpop.eup %774  ;;  %vm315_vm2 = vweird.f32 %v773_v58  ;;  %v520_v52 = vld [vmem:[#allocation8 + $0x60] sm:$0xff] }
 0x151   :  { %v264_v3 = vadd.f32 1.0, %v775_v61  ;;  %vm316_vm4 = vmor %vm314_vm3, %vm315_vm2  ;;  %585 = vmatpush.msrb.mxu1 %v520_v52  ;;  %v517_v61 = vld [vmem:[#allocation8 + $0x48] sm:$0xff] }
 0x152   :  { %v311_v62 = vsub.f32 1.0, %v310_v59  ;;  %v637_v59 = vld [vmem:[#allocation8 + $0x168] sm:$0xff] }
 0x153   :  { %776 = vrcp.f32 %v264_v3  ;;  %v276_v31 = vand.u32 2147483648, %v264_v3  ;;  %vm270_vm7 = vweird.f32 %v264_v3  ;;  %v274_v32 = vand.u32 2147483647, %v264_v3  ;;  %586 = vmatpush.msrb.mxu1 %v519_v54 }
 0x154   :  { %v312_v1 = vmul.f32 %v773_v58, %v311_v62  ;;  %v532_v62 = vld [vmem:[#allocation8 + $0xb8] sm:$0xff] }
 0x155   :  { %v277_v34 = vor.u32 1.1754944e-38, %v276_v31  ;;  %vm275_vm9 = vcmp.eq.f32.partialorder %v274_v32, 8.507059e+37  ;;  %587 = vmatpush.msrb.mxu1 %v518_v57  ;;  %549 = vmatpush.msrb.mxu0 %v532_v62  ;;  %v508_v31 = vld [vmem:[#allocation8] sm:$0xff] }
 0x156   :  { %v313_v4 = vadd.f32 %v773_v58, %v312_v1  ;;  %v531_v1 = vld [vmem:[#allocation8 + $0xb0] sm:$0xff] }
 0x157   :  { %588 = vmatpush.msrb.mxu1 %v517_v61  ;;  %550 = vmatpush.msrb.mxu0 %v531_v1 }
 0x158   :  { %v317_v8 = vsel %vm316_vm4, %v773_v58, %v313_v4  ;;  %v638_v58 = vld [vmem:[#allocation8 + $0x170] sm:$0xff]  ;;  %v530_v4 = vld [vmem:[#allocation8 + $0xa8] sm:$0xff] }
 0x159   :  { %v322_v10 = vsel %vm319_vm5, %v321_v7, %v317_v8  ;;  %v777_v14 = vpop.eup %776  ;;  %641 = vmatpush.msrb.mxu2 %v638_v58  ;;  %589 = vmatpush.msrb.mxu1 %v516_v63  ;;  %v529_v7 = vld [vmem:[#allocation8 + $0xa0] sm:$0xff]  ;;  %v513_v8 = vld [vmem:[#allocation8 + $0x28] sm:$0xff] }
 0x15a   :  { %v336_v11 = vperm.slane %v322_v10, 0  ;;  %v266_v15 = vmul.f32 %v777_v14, %v264_v3  ;;  %v335_v21 = vrot.slane %v322_v10, 1  ;;  %vm271_vm6 = vweird.f32 %v777_v14  ;;  %v635_v3 = vld [vmem:[#allocation8 + $0x158] sm:$0xff]  ;;  %551 = vmatpush.msrb.mxu0 %v530_v4 }
 0x15b   :  { %vm272_vm8 = vmor %vm270_vm7, %vm271_vm6  ;;  %642 = vmatpush.msrb.mxu2 %v637_v59  ;;  %590 = vmatpush.msrb.mxu1 %v515_v2  ;;  %v528_v10 = vld [vmem:[#allocation8 + $0x98] sm:$0xff] }
 0x15c   :  { %v340_v13 = vmul.f32 %v336_v11, %v1057_v16  ;;  %v341_v20 = vmul.f32 %v336_v11, %v1059_v17  ;;  %v267_v22 = vsub.f32 1.0, %v266_v15  ;;  %v337_v23 = vperm.slane %v335_v21, 0  ;;  %552 = vmatpush.msrb.mxu0 %v529_v7  ;;  %v512_v11 = vld [vmem:[#allocation8 + $0x20] sm:$0xff]  ;;  %v511_v15 = vld [vmem:[#allocation8 + $0x18] sm:$0xff]  ;;  %v526_v21 = vld [vmem:[#allocation8 + $0x88] sm:$0xff] }
 0x15d   :  { %643 = vmatpush.msrb.mxu2 %v636_v0  ;;  %591 = vmatpush.msrb.mxu1 %v514_v5 }
 0x15e   :  { %392 = vmatmul.f32.vlgmr.msrb.gmra.mxu3 %v340_v13  ;;  %v268_v28 = vmul.f32 %v777_v14, %v267_v22  ;;  %v342_v29 = vmul.f32 %v337_v23, %v1061_v18  ;;  %v343_v35 = vmul.f32 %v337_v23, %v1063_v19  ;;  %553 = vmatpush.msrb.mxu0 %v528_v10  ;;  %v632_v13 = vld [vmem:[#allocation8 + $0x140] sm:$0xff]  ;;  %v510_v22 = vld [vmem:[#allocation8 + $0x10] sm:$0xff] }
 0x15f   :  { %644 = vmatpush.msrb.mxu2 %v635_v3  ;;  %592 = vmatpush.msrb.mxu1 %v513_v8  ;;  %v630_v23 = vld [vmem:[#allocation8 + $0x130] sm:$0xff] }
 0x160   :  { %v269_v30 = vadd.f32 %v777_v14, %v268_v28  ;;  %v525_v28 = vld [vmem:[#allocation8 + $0x80] sm:$0xff] }
 0x161   :  { %645 = vmatpush.msrb.mxu2 %v634_v6  ;;  %593 = vmatpush.msrb.mxu1 %v512_v11 }
 0x162   :  { %v273_v33 = vsel %vm272_vm8, %v777_v14, %v269_v30  ;;  %v527_v14 = vld [vmem:[#allocation8 + $0x90] sm:$0xff]  ;;  %v629_v30 = vld [vmem:[#allocation8 + $0x128] sm:$0xff] }
 0x163   :  { %v278_v36 = vsel %vm275_vm9, %v277_v34, %v273_v33  ;;  %646 = vmatpush.msrb.mxu2 %v633_v9  ;;  %554 = vmatpush.msrb.mxu0 %v527_v14  ;;  %v628_v33 = vld [vmem:[#allocation8 + $0x120] sm:$0xff]  ;;  %v627_v34 = vld [vmem:[#allocation8 + $0x118] sm:$0xff] }
 0x164   :  { %v326_v37 = vperm.slane %v278_v36, 0  ;;  %v325_v40 = vrot.slane %v278_v36, 1  ;;  %594 = vmatpush.msrb.mxu1 %v511_v15  ;;  %v625_v36 = vld [vmem:[#allocation8 + $0x108] sm:$0xff] }
 0x165   :  { %647 = vmatpush.msrb.mxu2 %v632_v13  ;;  %555 = vmatpush.msrb.mxu0 %v526_v21 }
 0x166   :  { %395 = vmatmul.f32.gmra.mxu3 %v341_v20  ;;  %v330_v38 = vmul.f32 %v326_v37, %v1075_v24  ;;  %v331_v39 = vmul.f32 %v326_v37, %v1077_v25  ;;  %v327_v41 = vperm.slane %v325_v40, 0  ;;  %v631_v20 = vld [vmem:[#allocation8 + $0x138] sm:$0xff]  ;;  %595 = vmatpush.msrb.mxu1 %v510_v22 }
 0x167   :  { %648 = vmatpush.msrb.mxu2 %v631_v20  ;;  %556 = vmatpush.msrb.mxu0 %v525_v28  ;;  %v768_v40 = vld [vmem:[%s1301_s11] ss:$0 sm:$0xff] }
 0x168   :  { %v332_v42 = vmul.f32 %v327_v41, %v1079_v26  ;;  %v333_v43 = vmul.f32 %v327_v41, %v1081_v27 }
 0x169   :  { %649 = vmatpush.msrb.mxu2 %v630_v23 }
 0x16b   :  { %650 = vmatpush.msrb.mxu2 %v629_v30 }
 0x16d   :  { %651 = vmatpush.msrb.mxu2 %v628_v33 }
 0x16e   :  { %398 = vmatmul.f32.gmra.mxu3 %v342_v29  ;;  %v509_v29 = vld [vmem:[#allocation8 + $0x8] sm:$0xff] }
 0x16f   :  { %596 = vmatpush.msrb.mxu1 %v509_v29  ;;  %652 = vmatpush.msrb.mxu2 %v627_v34 }
 0x171   :  { %597 = vmatpush.msrb.mxu1 %v508_v31 }
 0x176   :  { %401 = vmatmul.f32.gmra.mxu3 %v343_v35  ;;  %v626_v35 = vld [vmem:[#allocation8 + $0x110] sm:$0xff] }
 0x177   :  { %653 = vmatpush.msrb.mxu2 %v626_v35 }
 0x179   :  { %654 = vmatpush.msrb.mxu2 %v625_v36 }
 0x17e   :  { %421 = vmatmul.f32.vlgmr.msra.gmra.mxu3 %v330_v38  ;;  %v624_v38 = vld [vmem:[#allocation8 + $0x100] sm:$0xff] }
 0x17f   :  { %655 = vmatpush.msrb.mxu2 %v624_v38  ;;  %v769_v38 = vld [vmem:[%s1303_s13] ss:$0 sm:$0xff]  ;;  %s912_s13 = smov [#allocation10]  }
 0x180   :  { %s725_s27 = sshll.u32 %s912_s13, 4  ;;  %s726_s27 = int_to_ptr.vmem [resolvable:$true] %s725_s27 }
 0x186   :  { %424 = vmatmul.f32.gmra.mxu3 %v331_v39 }
 0x18e   :  { %427 = vmatmul.f32.gmra.mxu3 %v332_v42 }
 0x196   :  { %430 = vmatmul.f32.gmra.mxu3 %v333_v43 }
 0x1e1   :  { %v393_v12 = vpop.f32.mrf.mxu3 }
 0x1e9   :  { %v396_v32 = vpop.f32.mrf.mxu3 }
 0x1f1   :  { %v399_v37 = vpop.f32.mrf.mxu3 }
 0x1f9   :  { %v402_v39 = vpop.f32.mrf.mxu3 }
 0x201   :  { %v422_v41 = vpop.f32.mrf.mxu3 }
 0x202   :  { %v423_v42 = vadd.f32 %v422_v41, %v393_v12 }
 0x204   :  { %v438_v43 = vadd.f32 %v768_v40, %v423_v42 }
 0x206   :  { %v442_v44 = vmul.f32 %v438_v43, %v1075_v24  ;;  %v446_v3 = vmul.f32 %v438_v43, %v1057_v16 }
 0x208   :  { %557 = vmatmul.f32.vlgmr.msrb.gmra.mxu0 %v442_v44  ;;  %v459_v46 = vrot.slane %v442_v44, 7  ;;  %v484_v52 = vrot.slane %v442_v44, 1  ;;  %v465_v4 = vrot.slane %v446_v3, 7  ;;  %v490_v7 = vrot.slane %v446_v3, 1 }
 0x209   :  { %v425_v47 = vpop.f32.mrf.mxu3 }
 0x20a   :  { %v426_v48 = vadd.f32 %v425_v47, %v396_v32  ;;  %747 = vmatmul.msk.f32.vlgmr.msrb.gmra.mxu1 %vm1250_vm11, %v459_v46 }
 0x20c   :  { %v439_v49 = vadd.f32 %v768_v40, %v426_v48 }
 0x20e   :  { %v443_v50 = vmul.f32 %v439_v49, %v1077_v25  ;;  %v447_v5 = vmul.f32 %v439_v49, %v1059_v17 }
 0x210   :  { %560 = vmatmul.f32.gmra.mxu0 %v443_v50  ;;  %v460_v51 = vrot.slane %v443_v50, 7  ;;  %v485_v24 = vrot.slane %v443_v50, 1  ;;  %v491_v6 = vrot.slane %v447_v5, 1 }
 0x211   :  { %v428_v53 = vpop.f32.mrf.mxu3 }
 0x212   :  { %v429_v54 = vadd.f32 %v428_v53, %v399_v37  ;;  %v461_v55 = vsel %vm458_vm10, %v459_v46, %v460_v51  ;;  %v486_v56 = vsel %vm483_vm12, %v484_v52, %v485_v24  ;;  %v492_v9 = vsel %vm483_vm12, %v490_v7, %v491_v6 }
 0x213   :  { %601 = vmatmul.f32.gmra.mxu1 %v461_v55  ;;  %656 = vmatmul.f32.vlgmr.msrb.gmra.mxu2 %v486_v56 }
 0x214   :  { %v440_v57 = vadd.f32 %v768_v40, %v429_v54 }
 0x216   :  { %v444_v58 = vmul.f32 %v440_v57, %v1079_v26  ;;  %v448_v16 = vmul.f32 %v440_v57, %v1061_v18 }
 0x218   :  { %563 = vmatmul.f32.gmra.mxu0 %v444_v58  ;;  %v462_v59 = vrot.slane %v444_v58, 7  ;;  %v487_v0 = vrot.slane %v444_v58, 1  ;;  %v468_v10 = vrot.slane %v448_v16, 7  ;;  %v493_v13 = vrot.slane %v448_v16, 1 }
 0x219   :  { %v431_v60 = vpop.f32.mrf.mxu3 }
 0x21a   :  { %v432_v25 = vadd.f32 %v431_v60, %v402_v39 }
 0x21b   :  { %749 = vmatmul.msk.f32.gmra.mxu1 %vm1250_vm11, %v462_v59  ;;  %754 = vmatmul.msk.f32.gmra.mxu2 %vm483_vm12, %v485_v24 }
 0x21c   :  { %v441_v61 = vadd.f32 %v768_v40, %v432_v25 }
 0x21e   :  { %v445_v62 = vmul.f32 %v441_v61, %v1081_v27  ;;  %v466_v27 = vrot.slane %v447_v5, 7  ;;  %v449_v17 = vmul.f32 %v441_v61, %v1063_v19 }
 0x220   :  { %566 = vmatmul.f32.gmra.mxu0 %v445_v62  ;;  %v463_v63 = vrot.slane %v445_v62, 7  ;;  %v488_v1 = vrot.slane %v445_v62, 1  ;;  %v467_v8 = vsel %vm458_vm10, %v465_v4, %v466_v27  ;;  %v469_v11 = vrot.slane %v449_v17, 7 }
 0x221   :  { %v494_v12 = vrot.slane %v449_v17, 1 }
 0x222   :  { %v464_v2 = vsel %vm458_vm10, %v462_v59, %v463_v63  ;;  %v489_v26 = vsel %vm483_vm12, %v487_v0, %v488_v1  ;;  %v470_v14 = vsel %vm458_vm10, %v468_v10, %v469_v11 }
 0x223   :  { %607 = vmatmul.f32.gmra.mxu1 %v464_v2  ;;  %662 = vmatmul.f32.gmra.mxu2 %v489_v26  ;;  %v495_v15 = vsel %vm483_vm12, %v493_v13, %v494_v12 }
 0x228   :  { %569 = vmatmul.f32.gmra.mxu0 %v446_v3 }
 0x22b   :  { %751 = vmatmul.msk.f32.gmra.mxu1 %vm1250_vm11, %v465_v4  ;;  %755 = vmatmul.msk.f32.gmra.mxu2 %vm483_vm12, %v488_v1 }
 0x230   :  { %572 = vmatmul.f32.gmra.mxu0 %v447_v5 }
 0x233   :  { %613 = vmatmul.f32.gmra.mxu1 %v467_v8  ;;  %668 = vmatmul.f32.gmra.mxu2 %v492_v9 }
 0x238   :  { %575 = vmatmul.f32.gmra.mxu0 %v448_v16 }
 0x23b   :  { %753 = vmatmul.msk.f32.gmra.mxu1 %vm1250_vm11, %v468_v10  ;;  %756 = vmatmul.msk.f32.gmra.mxu2 %vm483_vm12, %v491_v6 }
 0x240   :  { %578 = vmatmul.f32.gmra.mxu0 %v449_v17 }
 0x243   :  { %619 = vmatmul.f32.gmra.mxu1 %v470_v14  ;;  %674 = vmatmul.f32.gmra.mxu2 %v495_v15 }
 0x24b   :  { %757 = vmatmul.msk.f32.gmra.mxu2 %vm483_vm12, %v494_v12 }
 0x285   :  { %v558_v18 = vpop.f32.mrf.mxu0 }
 0x287   :  { %v599_v20 = vpop.f32.mrf.mxu1 }
 0x288   :  { %v600_v36 = vadd.f32 %v599_v20, %v558_v18 }
 0x28d   :  { %v561_v19 = vpop.f32.mrf.mxu0 }
 0x290   :  { %v602_v21 = vpop.f32.mrf.mxu1 }
 0x291   :  { %v603_v45 = vadd.f32 %v602_v21, %v561_v19 }
 0x295   :  { %v564_v28 = vpop.f32.mrf.mxu0 }
 0x296   :  { %v657_v22 = vpop.f32.mrf.mxu2 }
 0x297   :  { %v681_v37 = vadd.f32 %v657_v22, %v600_v36 }
 0x298   :  { %v605_v23 = vpop.f32.mrf.mxu1 }
 0x299   :  { %v693_v42 = vadd.f32 %v769_v38, %v681_v37  ;;  %v606_v56 = vadd.f32 %v605_v23, %v564_v28 }
 0x29b   :  { %v701_v47 = vmax.f32 %v693_v42, 0.0 }
 0x29d   :  { %v567_v31 = vpop.f32.mrf.mxu0 }
 0x29e   :  { %v660_v29 = vpop.f32.mrf.mxu2 }
 0x29f   :  { %v682_v48 = vadd.f32 %v660_v29, %v603_v45 }
 0x2a0   :  { %v608_v30 = vpop.f32.mrf.mxu1 }
 0x2a1   :  { %v694_v24 = vadd.f32 %v769_v38, %v682_v48  ;;  %v609_v26 = vadd.f32 %v608_v30, %v567_v31 }
 0x2a3   :  { %v702_v59 = vmax.f32 %v694_v24, 0.0 }
 0x2a5   :  { %v570_v34 = vpop.f32.mrf.mxu0 }
 0x2a6   :  { %v663_v32 = vpop.f32.mrf.mxu2 }
 0x2a7   :  { %v683_v60 = vadd.f32 %v663_v32, %v606_v56 }
 0x2a8   :  { %v611_v33 = vpop.f32.mrf.mxu1 }
 0x2a9   :  { %v612_v39 = vadd.f32 %v611_v33, %v570_v34  ;;  %v695_v0 = vadd.f32 %v769_v38, %v683_v60 }
 0x2ab   :  { %v703_v5 = vmax.f32 %v695_v0, 0.0 }
 0x2ad   :  { %v573_v44 = vpop.f32.mrf.mxu0 }
 0x2ae   :  { %v666_v35 = vpop.f32.mrf.mxu2 }
 0x2af   :  { %v684_v27 = vadd.f32 %v666_v35, %v609_v26 }
 0x2b0   :  { %v614_v40 = vpop.f32.mrf.mxu1 }
 0x2b1   :  { %v615_v50 = vadd.f32 %v614_v40, %v573_v44  ;;  %v696_v10 = vadd.f32 %v769_v38, %v684_v27 }
 0x2b3   :  { %v704_v13 = vmax.f32 %v696_v10, 0.0 }
 0x2b5   :  { %v576_v58 = vpop.f32.mrf.mxu0 }
 0x2b6   :  { %v669_v41 = vpop.f32.mrf.mxu2 }
 0x2b7   :  { %v685_v43 = vadd.f32 %v669_v41, %v612_v39 }
 0x2b8   :  { %v617_v55 = vpop.f32.mrf.mxu1 }
 0x2b9   :  { %v697_v46 = vadd.f32 %v769_v38, %v685_v43  ;;  %v618_v61 = vadd.f32 %v617_v55, %v576_v58 }
 0x2bb   :  { %v705_v49 = vmax.f32 %v697_v46, 0.0 }
 0x2bd   :  { %v709_v51 = vsub.f32 %v701_v47, %v705_v49  ;;  %v579_v7 = vpop.f32.mrf.mxu0 }
 0x2be   :  { %v672_v52 = vpop.f32.mrf.mxu2 }
 0x2bf   :  { %v713_v53 = vand.u32 2147483647, %v709_v51  ;;  %v686_v54 = vadd.f32 %v672_v52, %v615_v50 }
 0x2c0   :  { %v620_v4 = vpop.f32.mrf.mxu1 }
 0x2c1   :  { %717 = vst [vmem:[#allocation10] sm:$0xff] %v713_v53  ;;  %v698_v57 = vadd.f32 %v769_v38, %v686_v54  ;;  %v621_v8 = vadd.f32 %v620_v4, %v579_v7 }
 0x2c3   :  { %v706_v25 = vmax.f32 %v698_v57, 0.0 }
 0x2c5   :  { %v710_v62 = vsub.f32 %v702_v59, %v706_v25 }
 0x2c6   :  { %v675_v63 = vpop.f32.mrf.mxu2 }
 0x2c7   :  { %v714_v1 = vand.u32 2147483647, %v710_v62  ;;  %v687_v2 = vadd.f32 %v675_v63, %v618_v61 }
 0x2c9   :  { %718 = vst [vmem:[#allocation10 + $0x8] sm:$0xff] %v714_v1  ;;  %v699_v3 = vadd.f32 %v769_v38, %v687_v2 }
 0x2cb   :  { %v707_v6 = vmax.f32 %v699_v3, 0.0 }
 0x2cd   :  { %v711_v9 = vsub.f32 %v703_v5, %v707_v6 }
 0x2ce   :  { %v678_v16 = vpop.f32.mrf.mxu2 }
 0x2cf   :  { %v715_v17 = vand.u32 2147483647, %v711_v9  ;;  %v688_v11 = vadd.f32 %v678_v16, %v621_v8 }
 0x2d1   :  { %719 = vst [vmem:[#allocation10 + $0x10] sm:$0xff] %v715_v17  ;;  %v700_v12 = vadd.f32 %v769_v38, %v688_v11 }
 0x2d3   :  { %v708_v14 = vmax.f32 %v700_v12, 0.0 }
 0x2d5   :  { %v712_v15 = vsub.f32 %v704_v13, %v708_v14 }
 0x2d7   :  { %v716_v18 = vand.u32 2147483647, %v712_v15 }
 0x2d9   :  { %720 = vst [vmem:[#allocation10 + $0x18] sm:$0xff] %v716_v18 }
 0x2da   :  { %733 = dma.vmem_to_hbm [thread:$0]  %s726_s27, 512, %s728_s28, [#allocation4], %s907_s21, %s907_s21, %s908_s22  }
 0x2db   :  { %904 = dma.done.wait [#allocation4], 512  }
 0x2dc   :  { %905 = vsyncadd [#allocation4], 4294966784 }
 0x2dd   :  { %738 = vsyncpa [#allocation3], 1 }
 0x2de   :  { %739 = vsyncpa [#allocation6], 1 }
 0x2df   :  { %740 = vsyncpa [#allocation9], 1 }
 0x2e0   :  { %741 = vsyncpa [#allocation4], 1 }

</bundles_post_ra>
